<compile_context>
chip_gen: v7x
topology: tpu7x:2x2x1
jax: 0.10.0
libtpu: 0.0.40
codegen_flags: <defaults>
</compile_context>

<pallas_src>
import jax
import jax.numpy as jnp
from jax.experimental import pallas as pl
from jax.experimental.pallas import tpu as pltpu


# ---------------------------------------------------------------------------
# Kernels
# ---------------------------------------------------------------------------
def _b_block(a_ref, b_ref):
    """Current (tk, Cp) block of B.

    If B is VMEM-resident (full (Kd, Cp) view), slice the k-th (tk, Cp)
    window; if B is streamed per grid step, the ref already is that window.
    """
    tk = a_ref.shape[1]
    if b_ref.shape[0] == tk:
        return b_ref[...]
    k = pl.program_id(1)
    start = pl.multiple_of(k * tk, tk)
    return b_ref[pl.ds(start, tk), :]


def matmul_kernel(a_ref, b_ref, o_ref, acc_ref):
    """Tiled C = A @ B, bf16 operands, f32 accumulation, bf16 output."""
    k = pl.program_id(1)

    @pl.when(k == 0)
    def _():
        acc_ref[...] = jnp.zeros_like(acc_ref)

    acc_ref[...] += jnp.dot(a_ref[...], _b_block(a_ref, b_ref),
                            preferred_element_type=jnp.float32)

    @pl.when(k == pl.num_programs(1) - 1)
    def _():
        o_ref[...] = acc_ref[...].astype(o_ref.dtype)


def matmul_logsoftmax_kernel(a_ref, b_ref, bias_ref, o_ref, acc_ref):
    """Tiled (A @ B + bias) with a row-wise log_softmax epilogue, all f32."""
    k = pl.program_id(1)

    @pl.when(k == 0)
    def _():
        acc_ref[...] = jnp.zeros_like(acc_ref)

    acc_ref[...] += jnp.dot(a_ref[...], _b_block(a_ref, b_ref),
                            preferred_element_type=jnp.float32)

    @pl.when(k == pl.num_programs(1) - 1)
    def _():
        logits = acc_ref[...] + bias_ref[...]          # padded classes: -1e30
        m = jnp.max(logits, axis=1, keepdims=True)
        z = logits - m
        lse = jnp.log(jnp.sum(jnp.exp(z), axis=1, keepdims=True))
        o_ref[...] = z - lse


# ---------------------------------------------------------------------------
# Tiling helpers
# ---------------------------------------------------------------------------
def _round_up(x, m):
    return ((x + m - 1) // m) * m


def _pad_dim(d, target_tile):
    """Pad to a multiple of 128; if larger than one target tile, pad to a
    multiple of the target tile so tiles never degrade to 128."""
    d128 = _round_up(d, 128)
    if d128 <= target_tile:
        return d128
    return _round_up(d, target_tile)


def _pick_tile(dim, cap):
    """Largest multiple of 128 <= cap that divides `dim` (dim % 128 == 0)."""
    if dim <= cap:
        return dim
    t = max((min(cap, dim) // 128) * 128, 128)
    while dim % t != 0:
        t -= 128
    return t


def _vmem_budget_bytes():
    """Generation-aware VMEM working-set budget."""
    cap = 64 << 20  # conservative default: v7x physical VMEM per TensorCore
    try:
        info = pltpu.get_tpu_info()
        cap = int(getattr(info, "vmem_capacity_bytes", cap))
    except Exception:
        pass
    # Leave headroom for compiler-internal scratch; 100 MiB max on 128-MiB parts.
    return max(min(cap - (16 << 20), 100 << 20), 32 << 20)


# ---------------------------------------------------------------------------
# Pallas wrapper
# ---------------------------------------------------------------------------
def _tiled_matmul(a, b, bias=None):
    """a: (M, Kd) bf16, b: (Kd, Cp) bf16, bias: (1, Cp) f32 or None.

    Returns (M, Cp): bf16 for the plain matmul, f32 when the log_softmax
    epilogue (bias provided) is fused in.
    """
    M, Kd = a.shape
    Cp = b.shape[1]

    budget = _vmem_budget_bytes()
    big_vmem = budget > (64 << 20)           # v5e / v6e (128 MiB physical VMEM)

    # >=2 row tiles so the "parallel" axis can feed both v7x TensorCores.
    tm_cap = 1024
    if M >= 256:
        tm_cap = min(tm_cap, M // 2)
    tk_cap = 4096 if big_vmem else 2048

    # Keep B fully resident in VMEM when it comfortably fits (it is only
    # Kd x 128 bf16); otherwise stream (tk, Cp) tiles per grid step.
    b_resident_bytes = 2 * Kd * Cp * 2       # budget 2 buffers to be safe
    b_resident = b_resident_bytes <= budget // 3

    def work_bytes(tm, tk):
        a_bytes = 2 * tm * tk * 2                                 # A, double-buffered bf16
        b_bytes = b_resident_bytes if b_resident else 2 * tk * Cp * 2
        o_bytes = 2 * tm * Cp * 4                                 # out, f32 worst case
        acc_bytes = tm * Cp * 4                                   # f32 accumulator
        return a_bytes + b_bytes + o_bytes + acc_bytes + 2 * Cp * 4

    tm = _pick_tile(M, tm_cap)
    tk = _pick_tile(Kd, tk_cap)
    while work_bytes(tm, tk) > budget:
        if tk >= tm and tk > 128:
            tk = _pick_tile(Kd, max(tk // 2, 128))
        elif tm > 128:
            tm = _pick_tile(M, max(tm // 2, 128))
        else:
            break

    grid = (M // tm, Kd // tk)

    a_spec = pl.BlockSpec((tm, tk), lambda i, k: (i, k))
    if b_resident:
        # Constant index map -> fetched once, stays resident across the grid.
        b_spec = pl.BlockSpec((Kd, Cp), lambda i, k: (0, 0))
    else:
        b_spec = pl.BlockSpec((tk, Cp), lambda i, k: (k, 0))

    in_specs = [a_spec, b_spec]
    if bias is not None:
        kernel = matmul_logsoftmax_kernel
        in_specs.append(pl.BlockSpec((1, Cp), lambda i, k: (0, 0)))
        out_dtype = jnp.float32
        operands = (a, b, bias)
    else:
        kernel = matmul_kernel
        out_dtype = jnp.bfloat16
        operands = (a, b)

    vmem_limit = int(min(budget,
                         max(32 << 20, work_bytes(tm, tk) * 5 // 4 + (2 << 20))))

    return pl.pallas_call(
        kernel,
        out_shape=jax.ShapeDtypeStruct((M, Cp), out_dtype),
        grid_spec=pltpu.PrefetchScalarGridSpec(
            num_scalar_prefetch=0,
            grid=grid,
            in_specs=in_specs,
            out_specs=pl.BlockSpec((tm, Cp), lambda i, k: (i, 0)),
            scratch_shapes=[pltpu.VMEM((tm, Cp), jnp.float32)],
        ),
        compiler_params=pltpu.CompilerParams(
            dimension_semantics=("parallel", "arbitrary"),
            vmem_limit_bytes=vmem_limit,
        ),
    )(*operands)


# ---------------------------------------------------------------------------
# Graph glue + forward
# ---------------------------------------------------------------------------
def build_norm_adj_padded(edge_index, num_nodes, n_pad, dtype=jnp.bfloat16):
    """Dense GCN-normalized adjacency with self loops (PyG gcn_norm semantics),
    scattered directly into the padded (n_pad, n_pad) buffer and cast once."""
    src = edge_index[0]
    dst = edge_index[1]
    loop = jnp.arange(num_nodes, dtype=edge_index.dtype)
    src = jnp.concatenate([src, loop])
    dst = jnp.concatenate([dst, loop])
    deg = jnp.zeros((num_nodes,), jnp.float32).at[dst].add(1.0)
    deg_inv_sqrt = jnp.where(deg > 0, jax.lax.rsqrt(deg), 0.0)
    norm = deg_inv_sqrt[src] * deg_inv_sqrt[dst]
    # message flows source -> target: S[target, source] = norm
    S = jnp.zeros((n_pad, n_pad), jnp.float32).at[dst, src].add(norm)
    return S.astype(dtype)


def sgc_forward(x, edge_index, weight, bias, K=2):
    """x: (N, F) float32, edge_index: (2, E) int32,
    weight: (C, F) (torch Linear layout), bias: (C,). Returns (N, C) f32."""
    N, F = x.shape
    C = weight.shape[0]

    # Pad rows/features up to the target tile (512) so tiles stay large;
    # class dim only to 128 (lane-dense is enough; kernel is HBM-bound).
    N_p = _pad_dim(N, 512)
    F_p = _pad_dim(F, 512)
    C_p = _round_up(C, 128)

    Sp = build_norm_adj_padded(edge_index, N, N_p, jnp.bfloat16)   # (N_p, N_p)
    Xp = jnp.pad(x.astype(jnp.float32),
                 ((0, N_p - N), (0, F_p - F))).astype(jnp.bfloat16)
    Wp = jnp.pad(weight.T.astype(jnp.float32),
                 ((0, F_p - F), (0, C_p - C))).astype(jnp.bfloat16)
    # Padded classes get a huge negative bias so log_softmax ignores them
    # (safe because the epilogue and output stay in f32).
    bp = jnp.pad(bias.astype(jnp.float32).reshape(1, C),
                 ((0, 0), (0, C_p - C)), constant_values=-1e30)

    if K == 0:
        out_p = _tiled_matmul(Xp, Wp, bias=bp)
    else:
        h = _tiled_matmul(Xp, Wp)                 # H0 = X W       (N_p, C_p)
        for _ in range(K - 1):
            h = _tiled_matmul(Sp, h)              # H <- S H
        out_p = _tiled_matmul(Sp, h, bias=bp)     # last step + bias + log_softmax

    return out_p[:N, :C]


def reference_forward(x, edge_index, weight, bias, K=2):
    """Pure-JAX f32 reference with the original (S^K X) W + b ordering."""
    N = x.shape[0]
    S = build_norm_adj_padded(edge_index, N, N, jnp.float32)
    h = x.astype(jnp.float32)
    for _ in range(K):
        h = S @ h
    logits = h @ weight.T.astype(jnp.float32) + bias.astype(jnp.float32)
    return jax.nn.log_softmax(logits, axis=1)


if __name__ == "__main__":
    key = jax.random.PRNGKey(0)
    k_x, k_e, k_w, k_b = jax.random.split(key, 4)

    N, nfeat, nclass, K = 64, 32, 8, 2
    E = 256

    x = jax.random.normal(k_x, (N, nfeat), dtype=jnp.float32)
    edge_index = jax.random.randint(k_e, (2, E), 0, N, dtype=jnp.int32)

    # Deterministic parameter init (torch Linear-ish uniform bounds).
    bound = 1.0 / (nfeat ** 0.5)
    weight = jax.random.uniform(k_w, (nclass, nfeat), jnp.float32, -bound, bound)
    bias = jax.random.uniform(k_b, (nclass,), jnp.float32, -bound, bound)

    out = sgc_forward(x, edge_index, weight, bias, K=K)
    jax.block_until_ready(out)

    ref = reference_forward(x, edge_index, weight, bias, K=K)
    assert out.shape == (N, nclass)
    # bf16 matmul operands (f32 accumulation) -> relaxed tolerance vs f32 ref.
    assert jnp.allclose(out, ref, atol=5e-2, rtol=5e-2), (
        float(jnp.max(jnp.abs(out - ref))))

    print("KERNEL_OK")
</pallas_src>

<mosaic_0001>
module attributes {stable_mosaic.version = 11 : i64} {
  func.func @matmul_kernel(%arg0: i32, %arg1: i32, %arg2: memref<128x128xbf16, #tpu.memory_space<vmem>>, %arg3: memref<128x128xbf16, #tpu.memory_space<vmem>>, %arg4: memref<128x128xbf16, #tpu.memory_space<vmem>>, %arg5: memref<128x128xf32, #tpu.memory_space<vmem>>) attributes {dimension_semantics = [#tpu.dimension_semantics<parallel>, #tpu.dimension_semantics<arbitrary>], iteration_bounds = array<i64: 1, 1>, scalar_prefetch = 0 : i64, scratch_operands = 1 : i64, tpu.core_type = #tpu.core_type<tc>, window_params = [{transform_indices = @transform_0, window_bounds = array<i64: 128, 128>}, {pipeline_mode = #tpu.pipeline_mode<synchronous>, transform_indices = @transform_1, window_bounds = array<i64: 128, 128>}, {transform_indices = @transform_2, window_bounds = array<i64: 128, 128>}]} {
    %c0_i32 = arith.constant 0 : i32
    %0 = arith.cmpi eq, %arg1, %c0_i32 : i32
    %1 = arith.extui %0 : i1 to i32
    %c0_i32_0 = arith.constant 0 : i32
    %2 = arith.cmpi ne, %1, %c0_i32_0 : i32
    scf.if %2 {
      %cst_10 = arith.constant 0.000000e+00 : f32
      %12 = vector.broadcast %cst_10 : f32 to vector<128x128xf32>
      %c0_11 = arith.constant 0 : index
      %c0_12 = arith.constant 0 : index
      %13 = vector.load %arg5[%c0_11, %c0_12] : memref<128x128xf32, #tpu.memory_space<vmem>>, vector<128x128xf32>
      tpu.vector_store %arg5[%c0_11, %c0_12], %12 {strides = array<i32>} : memref<128x128xf32, #tpu.memory_space<vmem>>, vector<128x128xf32>,
    } else {
    }
    %c0 = arith.constant 0 : index
    %c0_1 = arith.constant 0 : index
    %3 = vector.load %arg5[%c0, %c0_1] : memref<128x128xf32, #tpu.memory_space<vmem>>, vector<128x128xf32>
    %c0_2 = arith.constant 0 : index
    %c0_3 = arith.constant 0 : index
    %4 = vector.load %arg2[%c0_2, %c0_3] : memref<128x128xbf16, #tpu.memory_space<vmem>>, vector<128x128xbf16>
    %c0_4 = arith.constant 0 : index
    %c0_5 = arith.constant 0 : index
    %5 = vector.load %arg3[%c0_4, %c0_5] : memref<128x128xbf16, #tpu.memory_space<vmem>>, vector<128x128xbf16>
    %cst = arith.constant dense<0.000000e+00> : vector<128x128xf32>
    %6 = tpu.matmul %4, %5, %cst {dimension_numbers = #tpu.dot_dimension_numbers<[1], [0], [0], [1], [0, 0, 1, 1], [], []>} : vector<128x128xbf16>, vector<128x128xbf16>, vector<128x128xf32> -> vector<128x128xf32>
    %7 = arith.addf %3, %6 : vector<128x128xf32>
    %c0_6 = arith.constant 0 : index
    %c0_7 = arith.constant 0 : index
    %8 = vector.load %arg5[%c0_6, %c0_7] : memref<128x128xf32, #tpu.memory_space<vmem>>, vector<128x128xf32>
    tpu.vector_store %arg5[%c0_6, %c0_7], %7 {strides = array<i32>} : memref<128x128xf32, #tpu.memory_space<vmem>>, vector<128x128xf32>,
    %c0_i32_8 = arith.constant 0 : i32
    %9 = arith.cmpi eq, %arg1, %c0_i32_8 : i32
    %10 = arith.extui %9 : i1 to i32
    %c0_i32_9 = arith.constant 0 : i32
    %11 = arith.cmpi ne, %10, %c0_i32_9 : i32
    scf.if %11 {
      %c0_10 = arith.constant 0 : index
      %c0_11 = arith.constant 0 : index
      %12 = vector.load %arg5[%c0_10, %c0_11] : memref<128x128xf32, #tpu.memory_space<vmem>>, vector<128x128xf32>
      %13 = arith.truncf %12 : vector<128x128xf32> to vector<128x128xbf16>
      %c0_12 = arith.constant 0 : index
      %c0_13 = arith.constant 0 : index
      %14 = vector.load %arg4[%c0_12, %c0_13] : memref<128x128xbf16, #tpu.memory_space<vmem>>, vector<128x128xbf16>
      tpu.vector_store %arg4[%c0_12, %c0_13], %13 {strides = array<i32>} : memref<128x128xbf16, #tpu.memory_space<vmem>>, vector<128x128xbf16>,
    } else {
    }
    return
  }
  func.func @transform_0(%arg0: i32, %arg1: i32) -> (i32, i32) {
    %c0_i32 = arith.constant 0 : i32
    return %arg0, %arg1 : i32, i32
  }
  func.func @transform_1(%arg0: i32, %arg1: i32) -> (i32, i32) {
    %c0_i32 = arith.constant 0 : i32
    %c0_i32_0 = arith.constant 0 : i32
    %c0_i32_1 = arith.constant 0 : i32
    return %c0_i32, %c0_i32_0 : i32, i32
  }
  func.func @transform_2(%arg0: i32, %arg1: i32) -> (i32, i32) {
    %c0_i32 = arith.constant 0 : i32
    %c0_i32_0 = arith.constant 0 : i32
    return %arg0, %c0_i32 : i32, i32
  }
}

</mosaic_0001>

<bundles_post_ra>
// kernel: tpu_custom_call.1
= control target key start
LH: loop header
LB: loop body
LE: loop exit
PB: predicated region body
PF: predicated region fallthrough
CT: control target
= control target key end

     0   :  { %7 = vsyncpa [#allocation4], 0  ;;  %s768_s0 = inlined_call_operand.hbm [shape: bf16[128,128], index: 0, kind: input, shape index: {}]   ;;  %s769_s1 = inlined_call_operand.hbm [shape: bf16[128,128], index: 1, kind: input, shape index: {}]   ;;  %s770_s2 = inlined_call_operand.hbm [shape: bf16[128,128], index: 2, kind: output, shape index: {}]  }
   0x1   :  { %8 = vsyncpa [#allocation7], 0 }
   0x2   :  { %9 = vsyncpa [#allocation5], 0  ;;  %s703_s9 = smov [#allocation3]   ;;  %s631_s13 = scalar_lea.hbm %s768_s0, 1024 }
   0x3   :  { %s15_s10 = sshll.u32 %s703_s9, 4  ;;  %p632_p0 = scmp.ne.s32.totalorder %s768_s0, %s631_s13  ;;  %s16_s10 = int_to_ptr.vmem [resolvable:$true] %s15_s10 }
   0x4   :  { %p635_p1 = scmp.lt.u32.totalorder %s631_s13, %s768_s0 }
   0x6   :  { %p637_p2 = pnand %p635_p1, %p632_p0 }
   0x8   :  { %640 = shalt.err (!%p637_p2)
}
   0x9   :  { %s641_s18 = scalar_lea.vmem %s16_s10, 1024  ;;  %p646_p4 = scmp.lt.s32.totalorder %s16_s10, %s16_s10 }
   0xa   :  { %p642_p3 = scmp.ne.s32.totalorder %s16_s10, %s641_s18  ;;  %p647_p5 = scmp.lt.s32.totalorder %s641_s18, %s641_s18 }
   0xc   :  { %p648_p6 = por %p647_p5, %p646_p4 }
   0xe   :  { %p649_p7 = pnand %p648_p6, %p642_p3 }
  0x10   :  { %652 = shalt.err (!%p649_p7)
}
  0x11   :  { %s704_s19 = smov 64   ;;  %s705_s20 = smov 4  }
  0x12   :  { %21 = dma.hbm_to_vmem [thread:$0]  %s768_s0, 1024, %s16_s10, [#allocation4], %s704_s19, %s704_s19, %s705_s20  }
  0x13   :  { %s706_s23 = smov [#allocation6]   ;;  %s653_s27 = scalar_lea.hbm %s769_s1, 1024 }
  0x14   :  { %s27_s24 = sshll.u32 %s706_s23, 4  ;;  %p654_p8 = scmp.ne.s32.totalorder %s769_s1, %s653_s27  ;;  %s28_s24 = int_to_ptr.vmem [resolvable:$true] %s27_s24 }
  0x15   :  { %p657_p9 = scmp.lt.u32.totalorder %s653_s27, %s769_s1 }
  0x17   :  { %p659_p10 = pnand %p657_p9, %p654_p8 }
  0x19   :  { %662 = shalt.err (!%p659_p10)
}
  0x1a   :  { %s663_s4 = scalar_lea.vmem %s28_s24, 1024  ;;  %p668_p12 = scmp.lt.s32.totalorder %s28_s24, %s28_s24 }
  0x1b   :  { %p664_p11 = scmp.ne.s32.totalorder %s28_s24, %s663_s4  ;;  %p669_p13 = scmp.lt.s32.totalorder %s663_s4, %s663_s4 }
  0x1d   :  { %p670_p0 = por %p669_p13, %p668_p12 }
  0x1f   :  { %p671_p1 = pnand %p670_p0, %p664_p11 }
  0x21   :  { %674 = shalt.err (!%p671_p1)
}
  0x22   :  { %33 = dma.hbm_to_vmem [thread:$0]  %s769_s1, 1024, %s28_s24, [#allocation7], %s704_s19, %s704_s19, %s705_s20  }
  0x23   :  { %697 = dma.done.wait [#allocation4], 1024  }
  0x24   :  { %698 = vsyncadd [#allocation4], 4294966272 }
  0x25   :  { %699 = dma.done.wait [#allocation7], 1024  }
  0x26   :  { %700 = vsyncadd [#allocation7], 4294966272  ;;  %v615_v0 = vld [vmem:[#allocation6] sm:$0xff]   ;;  %v616_v1 = vld [vmem:[#allocation6 + $0x8] sm:$0xff]   ;;  %s707_s1 = smov [#allocation8]  }
  0x27   :  { %562 = vmatprep.subr.bf16.mxu0 %v615_v0  ;;  %594 = vmatprep.subr.bf16.mxu1 %v615_v0  ;;  %v617_v2 = vld [vmem:[#allocation6 + $0x10] sm:$0xff]   ;;  %v618_v3 = vld [vmem:[#allocation6 + $0x18] sm:$0xff]   ;;  %v623_v4 = vld [vmem:[#allocation3] sm:$0xff]   ;;  %s438_s6 = sshll.u32 %s707_s1, 4  ;;  %s439_s6 = int_to_ptr.vmem [resolvable:$true] %s438_s6 }
  0x28   :  { %563 = vmatpush3.bf16.msra.mxu0 %v615_v0  ;;  %602 = vmatpush3.bf16.msra.mxu1 %v615_v0  ;;  %v624_v5 = vld [vmem:[#allocation3 + $0x20] sm:$0xff]   ;;  %v620_v7 = vld [vmem:[#allocation6 + $0x28] sm:$0xff]   ;;  %v621_v8 = vld [vmem:[#allocation6 + $0x30] sm:$0xff]   ;;  %s675_s7 = scalar_lea.vmem %s439_s6, 1024  ;;  %p680_p3 = scmp.lt.s32.totalorder %s439_s6, %s439_s6 }
  0x29   :  { %564 = vmatprep.subr.bf16.mxu0 %v616_v1  ;;  %595 = vmatprep.subr.bf16.mxu1 %v616_v1  ;;  %v619_v6 = vld [vmem:[#allocation6 + $0x20] sm:$0xff]   ;;  %v622_v9 = vld [vmem:[#allocation6 + $0x38] sm:$0xff]   ;;  %v625_v10 = vld [vmem:[#allocation3 + $0x8] sm:$0xff]   ;;  %p676_p2 = scmp.ne.s32.totalorder %s439_s6, %s675_s7  ;;  %p681_p4 = scmp.lt.s32.totalorder %s675_s7, %s675_s7 }
  0x2a   :  { %578 = vmatprep.mubr.bf16.mxu0 %v623_v4  ;;  %586 = vmatprep.mubr.bf16.mxu1 %v624_v5  ;;  %v626_v11 = vld [vmem:[#allocation3 + $0x28] sm:$0xff]   ;;  %v627_v12 = vld [vmem:[#allocation3 + $0x10] sm:$0xff]   ;;  %v629_v14 = vld [vmem:[#allocation3 + $0x18] sm:$0xff]  }
  0x2b   :  { %v628_v13 = vld [vmem:[#allocation3 + $0x30] sm:$0xff]   ;;  %v630_v15 = vld [vmem:[#allocation3 + $0x38] sm:$0xff]   ;;  %p682_p5 = por %p681_p4, %p680_p3 }
  0x2c   :  { %565 = vmatpush3.bf16.msra.mxu0 %v616_v1  ;;  %603 = vmatpush3.bf16.msra.mxu1 %v616_v1 }
  0x2d   :  { %566 = vmatprep.subr.bf16.mxu0 %v617_v2  ;;  %596 = vmatprep.subr.bf16.mxu1 %v617_v2  ;;  %p683_p6 = pnand %p682_p5, %p676_p2 }
  0x30   :  { %567 = vmatpush3.bf16.msra.mxu0 %v617_v2  ;;  %604 = vmatpush3.bf16.msra.mxu1 %v617_v2 }
  0x31   :  { %568 = vmatprep.subr.bf16.mxu0 %v618_v3  ;;  %597 = vmatprep.subr.bf16.mxu1 %v618_v3 }
  0x34   :  { %569 = vmatpush3.bf16.msra.mxu0 %v618_v3  ;;  %605 = vmatpush3.bf16.msra.mxu1 %v618_v3 }
  0x35   :  { %570 = vmatprep.subr.bf16.mxu0 %v619_v6  ;;  %598 = vmatprep.subr.bf16.mxu1 %v619_v6 }
  0x38   :  { %571 = vmatpush3.bf16.msra.mxu0 %v619_v6  ;;  %606 = vmatpush3.bf16.msra.mxu1 %v619_v6 }
  0x39   :  { %572 = vmatprep.subr.bf16.mxu0 %v620_v7  ;;  %599 = vmatprep.subr.bf16.mxu1 %v620_v7 }
  0x3c   :  { %573 = vmatpush3.bf16.msra.mxu0 %v620_v7  ;;  %607 = vmatpush3.bf16.msra.mxu1 %v620_v7 }
  0x3d   :  { %574 = vmatprep.subr.bf16.mxu0 %v621_v8  ;;  %600 = vmatprep.subr.bf16.mxu1 %v621_v8 }
  0x40   :  { %575 = vmatpush3.bf16.msra.mxu0 %v621_v8  ;;  %608 = vmatpush3.bf16.msra.mxu1 %v621_v8 }
  0x41   :  { %576 = vmatprep.subr.bf16.mxu0 %v622_v9  ;;  %601 = vmatprep.subr.bf16.mxu1 %v622_v9 }
  0x44   :  { %577 = vmatpush3.bf16.msra.mxu0 %v622_v9  ;;  %609 = vmatpush3.bf16.msra.mxu1 %v622_v9 }
  0x47   :  { %579 = vmatmul.mubr.bf16.vlgmr.msra.gmra.mrb[0].mxu0 %v625_v10  ;;  %587 = vmatmul.mubr.bf16.vlgmr.msra.gmra.mrb[0].mxu1 %v626_v11 }
  0x48   :  { %582 = vmatprep.mubr.bf16.mxu0 %v627_v12  ;;  %590 = vmatprep.mubr.bf16.mxu1 %v628_v13 }
  0x4f   :  { %583 = vmatmul.mubr.bf16.gmra.mrb[4].mxu0 %v629_v14  ;;  %591 = vmatmul.mubr.bf16.gmra.mrb[4].mxu1 %v630_v15 }
 0x11a   :  { %v580_v16 = vpop.f32.mrb[0].mxu0  ;;  %v588_v17 = vpop.f32.mrb[0].mxu1 }
 0x11b   :  { %v239_v18 = vpop.f32.mrb[1].mxu0  ;;  %v271_v19 = vpop.f32.mrb[1].mxu1 }
 0x11c   :  { %v581_v20 = vpop.f32.mrb[2].mxu0  ;;  %v589_v21 = vpop.f32.mrb[2].mxu1 }
 0x11d   :  { %v507_v22 = vpack.c.bf16 %v581_v20, %v580_v16  ;;  %v527_v23 = vpack.c.bf16 %v589_v21, %v588_v17  ;;  %v242_v24 = vpop.f32.mrb[3].mxu0  ;;  %v274_v25 = vpop.f32.mrb[3].mxu1 }
 0x11e   :  { %v502_v26 = vpack.c.bf16 %v242_v24, %v239_v18  ;;  %v522_v27 = vpack.c.bf16 %v274_v25, %v271_v19 }
 0x11f   :  { %539 = vst [vmem:[#allocation8 + $0x8] sm:$0xff] %v507_v22   ;;  %543 = vst [vmem:[#allocation8 + $0x28] sm:$0xff] %v527_v23  }
 0x120   :  { %503 = vst [vmem:[#allocation8] sm:$0xff] %v502_v26   ;;  %542 = vst [vmem:[#allocation8 + $0x20] sm:$0xff] %v522_v27  }
 0x122   :  { %v584_v28 = vpop.f32.mrb[4].mxu0  ;;  %v592_v29 = vpop.f32.mrb[4].mxu1 }
 0x123   :  { %v255_v30 = vpop.f32.mrb[5].mxu0  ;;  %v287_v31 = vpop.f32.mrb[5].mxu1 }
 0x124   :  { %v585_v32 = vpop.f32.mrb[6].mxu0  ;;  %v593_v33 = vpop.f32.mrb[6].mxu1 }
 0x125   :  { %v517_v34 = vpack.c.bf16 %v585_v32, %v584_v28  ;;  %v537_v35 = vpack.c.bf16 %v593_v33, %v592_v29  ;;  %v258_v36 = vpop.f32.mrb[7].mxu0  ;;  %v290_v37 = vpop.f32.mrb[7].mxu1 }
 0x126   :  { %v512_v38 = vpack.c.bf16 %v258_v36, %v255_v30  ;;  %v532_v39 = vpack.c.bf16 %v290_v37, %v287_v31 }
 0x127   :  { %541 = vst [vmem:[#allocation8 + $0x18] sm:$0xff] %v517_v34   ;;  %545 = vst [vmem:[#allocation8 + $0x38] sm:$0xff] %v537_v35  }
 0x128   :  { %540 = vst [vmem:[#allocation8 + $0x10] sm:$0xff] %v512_v38   ;;  %544 = vst [vmem:[#allocation8 + $0x30] sm:$0xff] %v532_v39  }
 0x129   :  { %686 = shalt.err (!%p683_p6)
}
 0x12a   :  { %s687_s10 = scalar_lea.hbm %s770_s2, 1024 }
 0x12b   :  { %p688_p7 = scmp.ne.s32.totalorder %s770_s2, %s687_s10  ;;  %p691_p8 = scmp.lt.u32.totalorder %s687_s10, %s770_s2 }
 0x12d   :  { %p693_p9 = pnand %p691_p8, %p688_p7 }
 0x12f   :  { %696 = shalt.err (!%p693_p9)
}
 0x130   :  { %444 = dma.vmem_to_hbm [thread:$0]  %s439_s6, 1024, %s770_s2, [#allocation5], %s704_s19, %s704_s19, %s705_s20  }
 0x131   :  { %701 = dma.done.wait [#allocation5], 1024  }
 0x132   :  { %702 = vsyncadd [#allocation5], 4294966272 }
 0x133   :  { %448 = vsyncpa [#allocation4], 1 }
 0x134   :  { %449 = vsyncpa [#allocation7], 1 }
 0x135   :  { %450 = vsyncpa [#allocation5], 1 }

</bundles_post_ra>
